<compile_context>
chip_gen: v5e
topology: v5e:2x2
jax: 0.10.0
libtpu: 0.0.40
codegen_flags: <defaults>
</compile_context>

<pallas_src>
import jax
import jax.numpy as jnp
from jax.experimental import pallas as pl
from jax.experimental.pallas import tpu as pltpu

BINARIZER_THRESHOLD = 5e-3  # standard piggyback DEFAULT_THRESHOLD


def _round_up(a, b):
    return (a + b - 1) // b * b


def _pad2d(a, rows, cols):
    """Zero-pad a 2D array to (rows, cols); no copy if already that size."""
    r, c = a.shape
    if r == rows and c == cols:
        return a
    return jnp.zeros((rows, cols), a.dtype).at[:r, :c].set(a)


def fold_piggyback_linear(w, m):
    """Fold the static binarized piggyback mask into the weight and transpose
    to (in, out) bf16 for the MXU.  Per-task constant: compute once & cache."""
    w_eff = w * (m > BINARIZER_THRESHOLD)
    return w_eff.T.astype(jnp.bfloat16)  # (in, out)


def _vmem_limit_bytes():
    """Per-generation VMEM budget: ~7/8 of physical, capped at 112 MiB."""
    try:
        cap = int(pltpu.get_tpu_info().vmem_capacity_bytes)
        return min(cap - cap // 8, 112 * 1024 * 1024)
    except Exception:
        return 48 * 1024 * 1024  # conservative fallback


def _two_mlp_head_kernel(x_ref, w6_ref, b6_ref, w7_ref, b7_ref, o_ref):
    """Grid = (batch_tiles,).  Weights / biases are VMEM-resident."""
    # fc6: (TM, K) x (K, REP) on the MXU, f32 accumulation; bias + ReLU in f32.
    h = jnp.dot(x_ref[...], w6_ref[...], preferred_element_type=jnp.float32)
    h = jnp.maximum(h + b6_ref[...], 0.0)
    # fc7: (TM, REP) x (REP, REP); h re-cast to bf16 for the MXU (inference
    # precision; accumulation stays f32).
    y = jnp.dot(h.astype(w7_ref.dtype), w7_ref[...],
                preferred_element_type=jnp.float32)
    o_ref[...] = jnp.maximum(y + b7_ref[...], 0.0).astype(o_ref.dtype)


def _resident_spec(shape, single_buffer):
    if single_buffer:
        # Single-buffer large resident operands so a ~25 MB fc6 weight fits
        # next to double-buffered x tiles within v7x's 64 MiB VMEM.
        return pl.BlockSpec(shape, lambda i: (0, 0),
                            pipeline_mode=pl.Buffered(1))
    return pl.BlockSpec(shape, lambda i: (0, 0))


def piggyback_two_mlp_head_folded(x_nchw, w6_t, b6, w7_t, b7, *, tm=None):
    """Forward with pre-folded, pre-transposed weights.

    x_nchw: (N, C, H, W); w6_t: (in, rep) bf16; w7_t: (rep, rep) bf16.
    Returns (N, rep) float32.
    """
    n = x_nchw.shape[0]
    xf = x_nchw.reshape(n, -1)                       # flatten(start_dim=1)
    in_f, rep = w6_t.shape
    assert xf.shape[1] == in_f and w7_t.shape == (rep, rep)

    # ---- batch tile size --------------------------------------------------
    n16 = _round_up(max(n, 1), 16)
    if tm is None:
        tm = 256 if n16 >= 512 else 128              # 256-row tiles feed the
    tm = min(tm, n16)                                # v6e/v7x 256-wide MXU
    if n16 >= 32:
        # keep >= 2 batch tiles so the "parallel" axis splits across v7x's
        # two TensorCores instead of leaving one idle
        tm = min(tm, _round_up(n16 // 2, 16))
    tm = max(tm, 16)

    n_p = _round_up(n, tm)
    in_p = _round_up(in_f, 128)
    rep_p = _round_up(rep, 128)
    gm = n_p // tm

    # ---- padded operands (copies skipped when already aligned) ------------
    xb = _pad2d(xf.astype(jnp.bfloat16), n_p, in_p)
    w6p = _pad2d(w6_t, in_p, rep_p)
    w7p = _pad2d(w7_t, rep_p, rep_p)
    b6p = _pad2d(b6.astype(jnp.float32).reshape(1, -1), 1, rep_p)
    b7p = _pad2d(b7.astype(jnp.float32).reshape(1, -1), 1, rep_p)

    # ---- VMEM budget & buffering of resident weights ----------------------
    vmem_limit = _vmem_limit_bytes()
    resident_bytes = (w6p.size + w7p.size) * 2 + (b6p.size + b7p.size) * 4
    single_buffer = 2 * resident_bytes > vmem_limit // 2

    flops = 2 * n_p * in_p * rep_p + 2 * n_p * rep_p * rep_p
    # Actual HBM traffic: every operand is streamed exactly once.
    bytes_accessed = (xb.size * 2 + w6p.size * 2 + w7p.size * 2 +
                      b6p.size * 4 + b7p.size * 4 + n_p * rep_p * 4)

    out = pl.pallas_call(
        _two_mlp_head_kernel,
        out_shape=jax.ShapeDtypeStruct((n_p, rep_p), jnp.float32),
        grid_spec=pltpu.PrefetchScalarGridSpec(
            num_scalar_prefetch=0,
            grid=(gm,),
            in_specs=[
                pl.BlockSpec((tm, in_p), lambda i: (i, 0)),     # x (streamed)
                _resident_spec((in_p, rep_p), single_buffer),   # w6 (resident)
                _resident_spec((1, rep_p), False),              # b6 (resident)
                _resident_spec((rep_p, rep_p), single_buffer),  # w7 (resident)
                _resident_spec((1, rep_p), False),              # b7 (resident)
            ],
            out_specs=pl.BlockSpec((tm, rep_p), lambda i: (i, 0)),
        ),
        compiler_params=pltpu.CompilerParams(
            dimension_semantics=("parallel",),
            vmem_limit_bytes=vmem_limit,
        ),
        cost_estimate=pl.CostEstimate(
            flops=flops, transcendentals=0, bytes_accessed=bytes_accessed),
    )(xb, w6p, b6p, w7p, b7p)

    return out[:n, :rep]


def piggyback_two_mlp_head(x_nchw, w6, m6, b6, w7, m7, b7, *, tm=None):
    """Convenience wrapper: folds the (per-task constant) binarized masks and
    transposes the weights, then runs the kernel.  For repeated forwards,
    fold once with fold_piggyback_linear and call *_folded directly."""
    w6_t = fold_piggyback_linear(w6, m6)
    w7_t = fold_piggyback_linear(w7, m7)
    return piggyback_two_mlp_head_folded(x_nchw, w6_t, b6, w7_t, b7, tm=tm)


def _reference(x_nchw, w6, m6, b6, w7, m7, b7):
    """Pure-JAX f32 reference matching the PyTorch module."""
    xf = x_nchw.reshape(x_nchw.shape[0], -1)
    w6e = w6 * (m6 > BINARIZER_THRESHOLD).astype(w6.dtype)
    h = jnp.maximum(xf @ w6e.T + b6, 0.0)
    w7e = w7 * (m7 > BINARIZER_THRESHOLD).astype(w7.dtype)
    return jnp.maximum(h @ w7e.T + b7, 0.0)


if __name__ == "__main__":
    # Small shapes: batch=2, channels=4, spatial=16x16 -> in_channels=1024,
    # representation_size=256.
    N, C, H, W = 2, 4, 16, 16
    in_channels = C * H * W
    representation_size = 256
    mask_scale = 0.006  # mask_init='1s' -> mask_real = mask_scale * ones

    key = jax.random.PRNGKey(0)
    kx, kw6, kb6, kw7, kb7 = jax.random.split(key, 5)

    x = jax.random.normal(kx, (N, C, H, W), dtype=jnp.float32)

    w6 = jax.random.normal(kw6, (representation_size, in_channels),
                           dtype=jnp.float32) * 0.02
    b6 = jax.random.normal(kb6, (representation_size,), dtype=jnp.float32) * 0.01
    w7 = jax.random.normal(kw7, (representation_size, representation_size),
                           dtype=jnp.float32) * 0.02
    b7 = jax.random.normal(kb7, (representation_size,), dtype=jnp.float32) * 0.01

    m6 = jnp.full((representation_size, in_channels), mask_scale, jnp.float32)
    m7 = jnp.full((representation_size, representation_size), mask_scale,
                  jnp.float32)

    fwd = jax.jit(piggyback_two_mlp_head)   # fuses mask fold / cast / pad
    out = fwd(x, w6, m6, b6, w7, m7, b7)
    out = jax.block_until_ready(out)

    ref = _reference(x, w6, m6, b6, w7, m7, b7)
    assert out.shape == (N, representation_size)
    # bf16 matmul inputs with f32 accumulation: relaxed tolerance vs f32 ref.
    assert jnp.allclose(out, ref, atol=5e-2, rtol=5e-2), (
        float(jnp.max(jnp.abs(out - ref))))

    print("KERNEL_OK")
</pallas_src>

<mosaic_0001>
module attributes {stable_mosaic.version = 11 : i64} {
  func.func @_two_mlp_head_kernel(%arg0: i32, %arg1: memref<16x1024xbf16, #tpu.memory_space<vmem>>, %arg2: memref<1024x256xbf16, #tpu.memory_space<vmem>>, %arg3: memref<1x256xf32, #tpu.memory_space<vmem>>, %arg4: memref<256x256xbf16, #tpu.memory_space<vmem>>, %arg5: memref<1x256xf32, #tpu.memory_space<vmem>>, %arg6: memref<16x256xf32, #tpu.memory_space<vmem>>) attributes {dimension_semantics = [#tpu.dimension_semantics<parallel>], iteration_bounds = array<i64: 1>, scalar_prefetch = 0 : i64, scratch_operands = 0 : i64, tpu.core_type = #tpu.core_type<tc>, window_params = [{transform_indices = @transform_0, window_bounds = array<i64: 16, 1024>}, {pipeline_mode = #tpu.pipeline_mode<synchronous>, transform_indices = @transform_1, window_bounds = array<i64: 1024, 256>}, {pipeline_mode = #tpu.pipeline_mode<synchronous>, transform_indices = @transform_2, window_bounds = array<i64: 1, 256>}, {pipeline_mode = #tpu.pipeline_mode<synchronous>, transform_indices = @transform_3, window_bounds = array<i64: 256, 256>}, {pipeline_mode = #tpu.pipeline_mode<synchronous>, transform_indices = @transform_4, window_bounds = array<i64: 1, 256>}, {transform_indices = @transform_5, window_bounds = array<i64: 16, 256>}]} {
    %c0 = arith.constant 0 : index
    %c0_0 = arith.constant 0 : index
    %0 = vector.load %arg1[%c0, %c0_0] : memref<16x1024xbf16, #tpu.memory_space<vmem>>, vector<16x1024xbf16>
    %c0_1 = arith.constant 0 : index
    %c0_2 = arith.constant 0 : index
    %1 = vector.load %arg2[%c0_1, %c0_2] : memref<1024x256xbf16, #tpu.memory_space<vmem>>, vector<1024x256xbf16>
    %cst = arith.constant dense<0.000000e+00> : vector<16x256xf32>
    %2 = tpu.matmul %0, %1, %cst {dimension_numbers = #tpu.dot_dimension_numbers<[1], [0], [0], [1], [0, 0, 1, 1], [], []>} : vector<16x1024xbf16>, vector<1024x256xbf16>, vector<16x256xf32> -> vector<16x256xf32>
    %c0_3 = arith.constant 0 : index
    %c0_4 = arith.constant 0 : index
    %3 = vector.load %arg3[%c0_3, %c0_4] : memref<1x256xf32, #tpu.memory_space<vmem>>, vector<1x256xf32>
    %4 = vector.broadcast %3 : vector<1x256xf32> to vector<16x256xf32>
    %5 = arith.addf %2, %4 : vector<16x256xf32>
    %cst_5 = arith.constant 0.000000e+00 : f32
    %6 = vector.broadcast %cst_5 : f32 to vector<16x256xf32>
    %7 = arith.maximumf %5, %6 : vector<16x256xf32>
    %8 = arith.truncf %7 : vector<16x256xf32> to vector<16x256xbf16>
    %c0_6 = arith.constant 0 : index
    %c0_7 = arith.constant 0 : index
    %9 = vector.load %arg4[%c0_6, %c0_7] : memref<256x256xbf16, #tpu.memory_space<vmem>>, vector<256x256xbf16>
    %cst_8 = arith.constant dense<0.000000e+00> : vector<16x256xf32>
    %10 = tpu.matmul %8, %9, %cst_8 {dimension_numbers = #tpu.dot_dimension_numbers<[1], [0], [0], [1], [0, 0, 1, 1], [], []>} : vector<16x256xbf16>, vector<256x256xbf16>, vector<16x256xf32> -> vector<16x256xf32>
    %c0_9 = arith.constant 0 : index
    %c0_10 = arith.constant 0 : index
    %11 = vector.load %arg5[%c0_9, %c0_10] : memref<1x256xf32, #tpu.memory_space<vmem>>, vector<1x256xf32>
    %12 = vector.broadcast %11 : vector<1x256xf32> to vector<16x256xf32>
    %13 = arith.addf %10, %12 : vector<16x256xf32>
    %cst_11 = arith.constant 0.000000e+00 : f32
    %14 = vector.broadcast %cst_11 : f32 to vector<16x256xf32>
    %15 = arith.maximumf %13, %14 : vector<16x256xf32>
    %c0_12 = arith.constant 0 : index
    %c0_13 = arith.constant 0 : index
    %16 = vector.load %arg6[%c0_12, %c0_13] : memref<16x256xf32, #tpu.memory_space<vmem>>, vector<16x256xf32>
    tpu.vector_store %arg6[%c0_12, %c0_13], %15 {strides = array<i32>} : memref<16x256xf32, #tpu.memory_space<vmem>>, vector<16x256xf32>,
    return
  }
  func.func @transform_0(%arg0: i32) -> (i32, i32) {
    %c0_i32 = arith.constant 0 : i32
    %c0_i32_0 = arith.constant 0 : i32
    return %arg0, %c0_i32 : i32, i32
  }
  func.func @transform_1(%arg0: i32) -> (i32, i32) {
    %c0_i32 = arith.constant 0 : i32
    %c0_i32_0 = arith.constant 0 : i32
    %c0_i32_1 = arith.constant 0 : i32
    return %c0_i32, %c0_i32_0 : i32, i32
  }
  func.func @transform_2(%arg0: i32) -> (i32, i32) {
    %c0_i32 = arith.constant 0 : i32
    %c0_i32_0 = arith.constant 0 : i32
    %c0_i32_1 = arith.constant 0 : i32
    return %c0_i32, %c0_i32_0 : i32, i32
  }
  func.func @transform_3(%arg0: i32) -> (i32, i32) {
    %c0_i32 = arith.constant 0 : i32
    %c0_i32_0 = arith.constant 0 : i32
    %c0_i32_1 = arith.constant 0 : i32
    return %c0_i32, %c0_i32_0 : i32, i32
  }
  func.func @transform_4(%arg0: i32) -> (i32, i32) {
    %c0_i32 = arith.constant 0 : i32
    %c0_i32_0 = arith.constant 0 : i32
    %c0_i32_1 = arith.constant 0 : i32
    return %c0_i32, %c0_i32_0 : i32, i32
  }
  func.func @transform_5(%arg0: i32) -> (i32, i32) {
    %c0_i32 = arith.constant 0 : i32
    %c0_i32_0 = arith.constant 0 : i32
    return %arg0, %c0_i32 : i32, i32
  }
}

</mosaic_0001>

<bundles_post_ra>
// kernel: piggyback_two_mlp_head.1
= control target key start
LH: loop header
LB: loop body
LE: loop exit
PB: predicated region body
PF: predicated region fallthrough
CT: control target
= control target key end

     0   :  { %s3270_s1 = inlined_call_operand.vmem [shape: bf16[1024,256], index: 1, kind: input, shape index: {}]   ;;  %s3271_s0 = inlined_call_operand.vmem [shape: bf16[16,1024], index: 0, kind: input, shape index: {}]   ;;  %s3272_s3 = inlined_call_operand.vmem [shape: bf16[256,256], index: 3, kind: input, shape index: {}]   ;;  %s3273_s2 = inlined_call_operand.vmem [shape: f32[1,256], index: 2, kind: input, shape index: {}]   ;;  %s3274_s4 = inlined_call_operand.vmem [shape: f32[1,256], index: 4, kind: input, shape index: {}]   ;;  %s3275_s5 = inlined_call_operand.vmem [shape: f32[16,256], index: 5, kind: output, shape index: {}]  }
   0x1   :  { %v1428_v0 = vld [vmem:[%s3270_s1 + $0x70] sm:$0xf]  ;;  %v2033_v1 = vld [vmem:[%s3270_s1 + $0x74] sm:$0xf0]  ;;  %v1420_v11 = vld [vmem:[%s3270_s1 + $0x60] sm:$0xf] }
   0x2   :  { %v1492_v2 = vld [vmem:[%s3270_s1 + $0xf0] sm:$0xf]  ;;  %v1429_v3 = vor.u32 %v2033_v1, %v1428_v0  ;;  %v2049_v4 = vld [vmem:[%s3270_s1 + $0xf4] sm:$0xf0]  ;;  %v2031_v13 = vld [vmem:[%s3270_s1 + $0x64] sm:$0xf0] }
   0x3   :  { %v1556_v5 = vld [vmem:[%s3270_s1 + $0x170] sm:$0xf]  ;;  %v2065_v6 = vld [vmem:[%s3270_s1 + $0x174] sm:$0xf0]  ;;  %v1493_v7 = vor.u32 %v2049_v4, %v1492_v2  ;;  %v1484_v14 = vld [vmem:[%s3270_s1 + $0xe0] sm:$0xf]  ;;  %v1421_v16 = vor.u32 %v2031_v13, %v1420_v11 }
   0x4   :  { %v1557_v8 = vor.u32 %v2065_v6, %v1556_v5  ;;  %v1620_v9 = vld [vmem:[%s3270_s1 + $0x1f0] sm:$0xf]  ;;  %v2081_v10 = vld [vmem:[%s3270_s1 + $0x1f4] sm:$0xf0]  ;;  %842 = vmatpush.bf16.msra.mxu0 %v1429_v3  ;;  %v2047_v15 = vld [vmem:[%s3270_s1 + $0xe4] sm:$0xf0] }
   0x5   :  { %v1621_v12 = vor.u32 %v2081_v10, %v1620_v9  ;;  %856 = vmatpush.bf16.msra.mxu1 %v1493_v7  ;;  %v1485_v17 = vor.u32 %v2047_v15, %v1484_v14  ;;  %v1548_v18 = vld [vmem:[%s3270_s1 + $0x160] sm:$0xf]  ;;  %v2063_v19 = vld [vmem:[%s3270_s1 + $0x164] sm:$0xf0]  ;;  %v1412_v23 = vld [vmem:[%s3270_s1 + $0x50] sm:$0xf] }
   0x6   :  { %870 = vmatpush.bf16.msra.mxu2 %v1557_v8  ;;  %v1612_v20 = vld [vmem:[%s3270_s1 + $0x1e0] sm:$0xf]  ;;  %v1549_v21 = vor.u32 %v2063_v19, %v1548_v18  ;;  %v2079_v22 = vld [vmem:[%s3270_s1 + $0x1e4] sm:$0xf0]  ;;  %v2029_v24 = vld [vmem:[%s3270_s1 + $0x54] sm:$0xf0] }
   0x7   :  { %884 = vmatpush.bf16.msra.mxu3 %v1621_v12  ;;  %v1613_v25 = vor.u32 %v2079_v22, %v1612_v20  ;;  %v1476_v26 = vld [vmem:[%s3270_s1 + $0xd0] sm:$0xf]  ;;  %v2045_v27 = vld [vmem:[%s3270_s1 + $0xd4] sm:$0xf0]  ;;  %v1413_v29 = vor.u32 %v2029_v24, %v1412_v23  ;;  %v1404_v35 = vld [vmem:[%s3270_s1 + $0x40] sm:$0xf] }
   0x8   :  { %v1540_v28 = vld [vmem:[%s3270_s1 + $0x150] sm:$0xf]  ;;  %843 = vmatpush.bf16.msra.mxu0 %v1421_v16  ;;  %v2061_v30 = vld [vmem:[%s3270_s1 + $0x154] sm:$0xf0]  ;;  %v1477_v33 = vor.u32 %v2045_v27, %v1476_v26  ;;  %v2027_v36 = vld [vmem:[%s3270_s1 + $0x44] sm:$0xf0] }
   0x9   :  { %v1604_v31 = vld [vmem:[%s3270_s1 + $0x1d0] sm:$0xf]  ;;  %v2077_v32 = vld [vmem:[%s3270_s1 + $0x1d4] sm:$0xf0]  ;;  %857 = vmatpush.bf16.msra.mxu1 %v1485_v17  ;;  %v1541_v34 = vor.u32 %v2061_v30, %v1540_v28  ;;  %v1468_v37 = vld [vmem:[%s3270_s1 + $0xc0] sm:$0xf]  ;;  %v1405_v44 = vor.u32 %v2027_v36, %v1404_v35 }
   0xa   :  { %871 = vmatpush.bf16.msra.mxu2 %v1549_v21  ;;  %v1605_v38 = vor.u32 %v2077_v32, %v1604_v31  ;;  %v2043_v39 = vld [vmem:[%s3270_s1 + $0xc4] sm:$0xf0]  ;;  %v1532_v40 = vld [vmem:[%s3270_s1 + $0x140] sm:$0xf]  ;;  %v1396_v47 = vld [vmem:[%s3270_s1 + $0x30] sm:$0xf] }
   0xb   :  { %885 = vmatpush.bf16.msra.mxu3 %v1613_v25  ;;  %v2059_v41 = vld [vmem:[%s3270_s1 + $0x144] sm:$0xf0]  ;;  %v1596_v42 = vld [vmem:[%s3270_s1 + $0x1c0] sm:$0xf]  ;;  %v1469_v45 = vor.u32 %v2043_v39, %v1468_v37  ;;  %v2025_v48 = vld [vmem:[%s3270_s1 + $0x34] sm:$0xf0] }
   0xc   :  { %v2075_v43 = vld [vmem:[%s3270_s1 + $0x1c4] sm:$0xf0]  ;;  %844 = vmatpush.bf16.msra.mxu0 %v1413_v29  ;;  %v1533_v46 = vor.u32 %v2059_v41, %v1532_v40  ;;  %v1460_v49 = vld [vmem:[%s3270_s1 + $0xb0] sm:$0xf]  ;;  %v2041_v51 = vld [vmem:[%s3270_s1 + $0xb4] sm:$0xf0]  ;;  %v1397_v56 = vor.u32 %v2025_v48, %v1396_v47 }
   0xd   :  { %858 = vmatpush.bf16.msra.mxu1 %v1477_v33  ;;  %v1597_v50 = vor.u32 %v2075_v43, %v1596_v42  ;;  %v1524_v52 = vld [vmem:[%s3270_s1 + $0x130] sm:$0xf]  ;;  %v2057_v53 = vld [vmem:[%s3270_s1 + $0x134] sm:$0xf0]  ;;  %v1461_v57 = vor.u32 %v2041_v51, %v1460_v49  ;;  %v1388_v59 = vld [vmem:[%s3270_s1 + $0x20] sm:$0xf] }
   0xe   :  { %872 = vmatpush.bf16.msra.mxu2 %v1541_v34  ;;  %v1588_v54 = vld [vmem:[%s3270_s1 + $0x1b0] sm:$0xf]  ;;  %v2073_v55 = vld [vmem:[%s3270_s1 + $0x1b4] sm:$0xf0]  ;;  %v1525_v58 = vor.u32 %v2057_v53, %v1524_v52  ;;  %v2023_v60 = vld [vmem:[%s3270_s1 + $0x24] sm:$0xf0] }
   0xf   :  { %886 = vmatpush.bf16.msra.mxu3 %v1605_v38  ;;  %v1452_v61 = vld [vmem:[%s3270_s1 + $0xa0] sm:$0xf]  ;;  %v1589_v62 = vor.u32 %v2073_v55, %v1588_v54  ;;  %v2039_v63 = vld [vmem:[%s3270_s1 + $0xa4] sm:$0xf0]  ;;  %v1389_v4 = vor.u32 %v2023_v60, %v1388_v59  ;;  %v1380_v7 = vld [vmem:[%s3270_s1 + $0x10] sm:$0xf] }
  0x10   :  { %845 = vmatpush.bf16.msra.mxu0 %v1405_v44  ;;  %v1516_v0 = vld [vmem:[%s3270_s1 + $0x120] sm:$0xf]  ;;  %v2055_v1 = vld [vmem:[%s3270_s1 + $0x124] sm:$0xf0]  ;;  %v1453_v5 = vor.u32 %v2039_v63, %v1452_v61  ;;  %v2021_v8 = vld [vmem:[%s3270_s1 + $0x14] sm:$0xf0] }
  0x11   :  { %859 = vmatpush.bf16.msra.mxu1 %v1469_v45  ;;  %v1580_v2 = vld [vmem:[%s3270_s1 + $0x1a0] sm:$0xf]  ;;  %v2071_v3 = vld [vmem:[%s3270_s1 + $0x1a4] sm:$0xf0]  ;;  %v1517_v6 = vor.u32 %v2055_v1, %v1516_v0  ;;  %v1444_v9 = vld [vmem:[%s3270_s1 + $0x90] sm:$0xf]  ;;  %v1381_v16 = vor.u32 %v2021_v8, %v1380_v7 }
  0x12   :  { %873 = vmatpush.bf16.msra.mxu2 %v1533_v46  ;;  %v1581_v10 = vor.u32 %v2071_v3, %v1580_v2  ;;  %v2037_v11 = vld [vmem:[%s3270_s1 + $0x94] sm:$0xf0]  ;;  %v1508_v12 = vld [vmem:[%s3270_s1 + $0x110] sm:$0xf]  ;;  %v1372_v17 = vld [vmem:[%s3270_s1] sm:$0xf] }
  0x13   :  { %887 = vmatpush.bf16.msra.mxu3 %v1597_v50  ;;  %v2053_v13 = vld [vmem:[%s3270_s1 + $0x114] sm:$0xf0]  ;;  %v1572_v14 = vld [vmem:[%s3270_s1 + $0x190] sm:$0xf]  ;;  %v2019_v18 = vld [vmem:[%s3270_s1 + $0x4] sm:$0xf0]  ;;  %v1445_v19 = vor.u32 %v2037_v11, %v1444_v9 }
  0x14   :  { %846 = vmatpush.bf16.msra.mxu0 %v1397_v56  ;;  %v2069_v15 = vld [vmem:[%s3270_s1 + $0x194] sm:$0xf0]  ;;  %v1509_v20 = vor.u32 %v2053_v13, %v1508_v12  ;;  %v1436_v21 = vld [vmem:[%s3270_s1 + $0x80] sm:$0xf]  ;;  %v2035_v22 = vld [vmem:[%s3270_s1 + $0x84] sm:$0xf0]  ;;  %v1373_v31 = vor.u32 %v2019_v18, %v1372_v17 }
  0x15   :  { %860 = vmatpush.bf16.msra.mxu1 %v1461_v57  ;;  %v1500_v23 = vld [vmem:[%s3270_s1 + $0x100] sm:$0xf]  ;;  %v1573_v24 = vor.u32 %v2069_v15, %v1572_v14  ;;  %v2051_v25 = vld [vmem:[%s3270_s1 + $0x104] sm:$0xf0]  ;;  %v1684_v28 = vld [vmem:[%s3270_s1 + $0x270] sm:$0xf]  ;;  %v1437_v35 = vor.u32 %v2035_v22, %v1436_v21 }
  0x16   :  { %874 = vmatpush.bf16.msra.mxu2 %v1525_v58  ;;  %v1564_v26 = vld [vmem:[%s3270_s1 + $0x180] sm:$0xf]  ;;  %v2067_v27 = vld [vmem:[%s3270_s1 + $0x184] sm:$0xf0]  ;;  %v2097_v29 = vld [vmem:[%s3270_s1 + $0x274] sm:$0xf0]  ;;  %v1501_v36 = vor.u32 %v2051_v25, %v1500_v23 }
  0x17   :  { %888 = vmatpush.bf16.msra.mxu3 %v1589_v62  ;;  %v1748_v30 = vld [vmem:[%s3270_s1 + $0x2f0] sm:$0xf]  ;;  %v2113_v32 = vld [vmem:[%s3270_s1 + $0x2f4] sm:$0xf0]  ;;  %v1565_v39 = vor.u32 %v2067_v27, %v1564_v26  ;;  %v1685_v40 = vor.u32 %v2097_v29, %v1684_v28  ;;  %v1676_v41 = vld [vmem:[%s3270_s1 + $0x260] sm:$0xf] }
  0x18   :  { %847 = vmatpush.bf16.msra.mxu0 %v1389_v4  ;;  %v1812_v33 = vld [vmem:[%s3270_s1 + $0x370] sm:$0xf]  ;;  %v2129_v34 = vld [vmem:[%s3270_s1 + $0x374] sm:$0xf0]  ;;  %v2095_v42 = vld [vmem:[%s3270_s1 + $0x264] sm:$0xf0]  ;;  %v1749_v43 = vor.u32 %v2113_v32, %v1748_v30 }
  0x19   :  { %861 = vmatpush.bf16.msra.mxu1 %v1453_v5  ;;  %v1876_v37 = vld [vmem:[%s3270_s1 + $0x3f0] sm:$0xf]  ;;  %v2145_v38 = vld [vmem:[%s3270_s1 + $0x3f4] sm:$0xf0]  ;;  %v1813_v44 = vor.u32 %v2129_v34, %v1812_v33  ;;  %v1740_v45 = vld [vmem:[%s3270_s1 + $0x2e0] sm:$0xf]  ;;  %v1677_v55 = vor.u32 %v2095_v42, %v1676_v41 }
  0x1a   :  { %875 = vmatpush.bf16.msra.mxu2 %v1517_v6  ;;  %v2111_v46 = vld [vmem:[%s3270_s1 + $0x2e4] sm:$0xf0]  ;;  %v1804_v47 = vld [vmem:[%s3270_s1 + $0x360] sm:$0xf]  ;;  %v1877_v48 = vor.u32 %v2145_v38, %v1876_v37  ;;  %v1668_v56 = vld [vmem:[%s3270_s1 + $0x250] sm:$0xf] }
  0x1b   :  { %889 = vmatpush.bf16.msra.mxu3 %v1581_v10  ;;  %v2127_v49 = vld [vmem:[%s3270_s1 + $0x364] sm:$0xf0]  ;;  %v1868_v50 = vld [vmem:[%s3270_s1 + $0x3e0] sm:$0xf]  ;;  %v2093_v57 = vld [vmem:[%s3270_s1 + $0x254] sm:$0xf0]  ;;  %v1741_v60 = vor.u32 %v2111_v46, %v1740_v45 }
  0x1c   :  { %848 = vmatpush.bf16.msra.mxu0 %v1381_v16  ;;  %v2143_v51 = vld [vmem:[%s3270_s1 + $0x3e4] sm:$0xf0]  ;;  %v1340_v52 = vld [vmem:[%s3271_s0] sm:$0xf]  ;;  %v1805_v61 = vor.u32 %v2127_v49, %v1804_v47  ;;  %v1732_v62 = vld [vmem:[%s3270_s1 + $0x2d0] sm:$0xf]  ;;  %v1669_v9 = vor.u32 %v2093_v57, %v1668_v56 }
  0x1d   :  { %862 = vmatpush.bf16.msra.mxu1 %v1445_v19  ;;  %v2014_v53 = vld [vmem:[%s3271_s0 + $0x1c] sm:$0xf0]  ;;  %v1348_v54 = vld [vmem:[%s3271_s0 + $0x8] sm:$0xf]  ;;  %v2109_v63 = vld [vmem:[%s3270_s1 + $0x2d4] sm:$0xf0]  ;;  %v1869_v2 = vor.u32 %v2143_v51, %v1868_v50 }
  0x1e   :  { %876 = vmatpush.bf16.msra.mxu2 %v1509_v20  ;;  %v2463_v58 = vor.u32 %v2014_v53, %v1340_v52  ;;  %v2015_v59 = vld [vmem:[%s3271_s0 + $0x24] sm:$0xf0]  ;;  %v1796_v0 = vld [vmem:[%s3270_s1 + $0x350] sm:$0xf]  ;;  %v2125_v3 = vld [vmem:[%s3270_s1 + $0x354] sm:$0xf0]  ;;  %v1733_v12 = vor.u32 %v2109_v63, %v1732_v62 }
  0x1f   :  { %890 = vmatpush.bf16.msra.mxu3 %v1573_v24  ;;  %v2477_v1 = vor.u32 %v2015_v59, %v1348_v54  ;;  %v1860_v4 = vld [vmem:[%s3270_s1 + $0x3d0] sm:$0xf]  ;;  %v2141_v5 = vld [vmem:[%s3270_s1 + $0x3d4] sm:$0xf0]  ;;  %v2010_v6 = vld [vmem:[%s3271_s0 + $0x4] sm:$0xf]  ;;  %v1797_v13 = vor.u32 %v2125_v3, %v1796_v0 }
  0x20   :  { %849 = vmatpush.bf16.msra.mxu0 %v1373_v31  ;;  %v1342_v7 = vld [vmem:[%s3271_s0 + $0x20] sm:$0xf0]  ;;  %v2011_v8 = vld [vmem:[%s3271_s0 + $0xc] sm:$0xf]  ;;  %v1660_v14 = vld [vmem:[%s3270_s1 + $0x240] sm:$0xf]  ;;  %v1861_v18 = vor.u32 %v2141_v5, %v1860_v4 }
  0x21   :  { %863 = vmatpush.bf16.msra.mxu1 %v1437_v35  ;;  %v2499_v10 = vor.u32 %v2010_v6, %v1342_v7  ;;  %v1350_v11 = vld [vmem:[%s3271_s0 + $0x28] sm:$0xf0]  ;;  %v2091_v15 = vld [vmem:[%s3270_s1 + $0x244] sm:$0xf0]  ;;  %v1724_v16 = vld [vmem:[%s3270_s1 + $0x2c0] sm:$0xf] }
  0x22   :  { %877 = vmatpush.bf16.msra.mxu2 %v1501_v36  ;;  %v2513_v17 = vor.u32 %v2011_v8, %v1350_v11  ;;  %v2107_v19 = vld [vmem:[%s3270_s1 + $0x2c4] sm:$0xf0]  ;;  %v1788_v20 = vld [vmem:[%s3270_s1 + $0x340] sm:$0xf]  ;;  %v1661_v24 = vor.u32 %v2091_v15, %v1660_v14  ;;  %v1652_v27 = vld [vmem:[%s3270_s1 + $0x230] sm:$0xf] }
  0x23   :  { %891 = vmatpush.bf16.msra.mxu3 %v1565_v39  ;;  %850 = vmatmul.bf16.vlgmr.msra.gmra.mxu0 %v2463_v58  ;;  %v2123_v21 = vld [vmem:[%s3270_s1 + $0x344] sm:$0xf0]  ;;  %v1852_v22 = vld [vmem:[%s3270_s1 + $0x3c0] sm:$0xf]  ;;  %v1725_v25 = vor.u32 %v2107_v19, %v1724_v16  ;;  %v2089_v28 = vld [vmem:[%s3270_s1 + $0x234] sm:$0xf0] }
  0x24   :  { %898 = vmatpush.bf16.msrb.mxu0 %v1685_v40  ;;  %864 = vmatmul.bf16.vlgmr.msra.gmra.mxu1 %v2499_v10  ;;  %v2139_v23 = vld [vmem:[%s3270_s1 + $0x3c4] sm:$0xf0]  ;;  %v1789_v26 = vor.u32 %v2123_v21, %v1788_v20  ;;  %v1716_v29 = vld [vmem:[%s3270_s1 + $0x2b0] sm:$0xf]  ;;  %v2105_v31 = vld [vmem:[%s3270_s1 + $0x2b4] sm:$0xf0]  ;;  %v1653_v36 = vor.u32 %v2089_v28, %v1652_v27 }
  0x25   :  { %912 = vmatpush.bf16.msrb.mxu1 %v1749_v43  ;;  %878 = vmatmul.bf16.vlgmr.msra.gmra.mxu2 %v2477_v1  ;;  %v1853_v30 = vor.u32 %v2139_v23, %v1852_v22  ;;  %v1780_v32 = vld [vmem:[%s3270_s1 + $0x330] sm:$0xf]  ;;  %v2121_v33 = vld [vmem:[%s3270_s1 + $0x334] sm:$0xf0]  ;;  %v1717_v37 = vor.u32 %v2105_v31, %v1716_v29  ;;  %v1644_v39 = vld [vmem:[%s3270_s1 + $0x220] sm:$0xf] }
  0x26   :  { %926 = vmatpush.bf16.msrb.mxu2 %v1813_v44  ;;  %892 = vmatmul.bf16.vlgmr.msra.gmra.mxu3 %v2513_v17  ;;  %v1844_v34 = vld [vmem:[%s3270_s1 + $0x3b0] sm:$0xf]  ;;  %v2137_v35 = vld [vmem:[%s3270_s1 + $0x3b4] sm:$0xf0]  ;;  %v1781_v38 = vor.u32 %v2121_v33, %v1780_v32  ;;  %v2087_v40 = vld [vmem:[%s3270_s1 + $0x224] sm:$0xf0] }
  0x27   :  { %940 = vmatpush.bf16.msrb.mxu3 %v1877_v48  ;;  %v1708_v41 = vld [vmem:[%s3270_s1 + $0x2a0] sm:$0xf]  ;;  %v1845_v42 = vor.u32 %v2137_v35, %v1844_v34  ;;  %v2103_v43 = vld [vmem:[%s3270_s1 + $0x2a4] sm:$0xf0]  ;;  %v1645_v48 = vor.u32 %v2087_v40, %v1644_v39  ;;  %v1636_v49 = vld [vmem:[%s3270_s1 + $0x210] sm:$0xf] }
  0x28   :  { %899 = vmatpush.bf16.msrb.mxu0 %v1677_v55  ;;  %v1772_v44 = vld [vmem:[%s3270_s1 + $0x320] sm:$0xf]  ;;  %v2119_v45 = vld [vmem:[%s3270_s1 + $0x324] sm:$0xf0]  ;;  %v1709_v50 = vor.u32 %v2103_v43, %v1708_v41  ;;  %v2085_v52 = vld [vmem:[%s3270_s1 + $0x214] sm:$0xf0] }
  0x29   :  { %913 = vmatpush.bf16.msrb.mxu1 %v1741_v60  ;;  %v1836_v46 = vld [vmem:[%s3270_s1 + $0x3a0] sm:$0xf]  ;;  %v2135_v47 = vld [vmem:[%s3270_s1 + $0x3a4] sm:$0xf0]  ;;  %v1773_v51 = vor.u32 %v2119_v45, %v1772_v44  ;;  %v1700_v53 = vld [vmem:[%s3270_s1 + $0x290] sm:$0xf]  ;;  %v1637_v63 = vor.u32 %v2085_v52, %v1636_v49 }
  0x2a   :  { %927 = vmatpush.bf16.msrb.mxu2 %v1805_v61  ;;  %v2101_v54 = vld [vmem:[%s3270_s1 + $0x294] sm:$0xf0]  ;;  %v1837_v55 = vor.u32 %v2135_v47, %v1836_v46  ;;  %v1764_v56 = vld [vmem:[%s3270_s1 + $0x310] sm:$0xf]  ;;  %v1628_v61 = vld [vmem:[%s3270_s1 + $0x200] sm:$0xf] }
  0x2b   :  { %941 = vmatpush.bf16.msrb.mxu3 %v1869_v2  ;;  %v2117_v57 = vld [vmem:[%s3270_s1 + $0x314] sm:$0xf0]  ;;  %v1828_v59 = vld [vmem:[%s3270_s1 + $0x390] sm:$0xf]  ;;  %v2083_v62 = vld [vmem:[%s3270_s1 + $0x204] sm:$0xf0]  ;;  %v1701_v5 = vor.u32 %v2101_v54, %v1700_v53 }
  0x2c   :  { %900 = vmatpush.bf16.msrb.mxu0 %v1669_v9  ;;  %v2133_v60 = vld [vmem:[%s3270_s1 + $0x394] sm:$0xf0]  ;;  %v1692_v0 = vld [vmem:[%s3270_s1 + $0x280] sm:$0xf]  ;;  %v2099_v2 = vld [vmem:[%s3270_s1 + $0x284] sm:$0xf0]  ;;  %v1765_v6 = vor.u32 %v2117_v57, %v1764_v56  ;;  %v1629_v19 = vor.u32 %v2083_v62, %v1628_v61 }
  0x2d   :  { %914 = vmatpush.bf16.msrb.mxu1 %v1733_v12  ;;  %v1756_v3 = vld [vmem:[%s3270_s1 + $0x300] sm:$0xf]  ;;  %v2115_v4 = vld [vmem:[%s3270_s1 + $0x304] sm:$0xf0]  ;;  %v2032_v9 = vld [vmem:[%s3270_s1 + $0x74] sm:$0xf]  ;;  %v1829_v11 = vor.u32 %v2133_v60, %v1828_v59  ;;  %v1693_v23 = vor.u32 %v2099_v2, %v1692_v0 }
  0x2e   :  { %928 = vmatpush.bf16.msrb.mxu2 %v1797_v13  ;;  %v1820_v7 = vld [vmem:[%s3270_s1 + $0x380] sm:$0xf]  ;;  %v2131_v8 = vld [vmem:[%s3270_s1 + $0x384] sm:$0xf0]  ;;  %v1430_v12 = vld [vmem:[%s3270_s1 + $0x78] sm:$0xf0] }
  0x2f   :  { %942 = vmatpush.bf16.msrb.mxu3 %v1861_v18  ;;  %v2048_v13 = vld [vmem:[%s3270_s1 + $0xf4] sm:$0xf]  ;;  %v1494_v14 = vld [vmem:[%s3270_s1 + $0xf8] sm:$0xf0]  ;;  %v1356_v21 = vld [vmem:[%s3271_s0 + $0x10] sm:$0xf]  ;;  %v1821_v28 = vor.u32 %v2131_v8, %v1820_v7  ;;  %v1433_v29 = vor.u32 %v2032_v9, %v1430_v12 }
  0x30   :  { %901 = vmatpush.bf16.msrb.mxu0 %v1661_v24  ;;  %v2064_v15 = vld [vmem:[%s3270_s1 + $0x174] sm:$0xf]  ;;  %v1558_v16 = vld [vmem:[%s3270_s1 + $0x178] sm:$0xf0]  ;;  %v2016_v22 = vld [vmem:[%s3271_s0 + $0x2c] sm:$0xf0]  ;;  %v1757_v24 = vor.u32 %v2115_v4, %v1756_v3  ;;  %v1497_v33 = vor.u32 %v2048_v13, %v1494_v14 }
  0x31   :  { %915 = vmatpush.bf16.msrb.mxu1 %v1725_v25  ;;  %v2080_v18 = vld [vmem:[%s3270_s1 + $0x1f4] sm:$0xf]  ;;  %v1622_v20 = vld [vmem:[%s3270_s1 + $0x1f8] sm:$0xf0]  ;;  %v1364_v25 = vld [vmem:[%s3271_s0 + $0x18] sm:$0xf]  ;;  %v1561_v34 = vor.u32 %v2064_v15, %v1558_v16  ;;  %v2685_v39 = vor.u32 %v2016_v22, %v1356_v21 }
  0x32   :  { %929 = vmatpush.bf16.msrb.mxu2 %v1789_v26  ;;  %v2017_v26 = vld [vmem:[%s3271_s0 + $0x34] sm:$0xf0]  ;;  %v2012_v27 = vld [vmem:[%s3271_s0 + $0x14] sm:$0xf]  ;;  %v2013_v31 = vld [vmem:[%s3271_s0 + $0x1c] sm:$0xf] }
  0x33   :  { %943 = vmatpush.bf16.msrb.mxu3 %v1853_v30  ;;  %v1358_v30 = vld [vmem:[%s3271_s0 + $0x30] sm:$0xf0]  ;;  %v1366_v32 = vld [vmem:[%s3271_s0 + $0x38] sm:$0xf0]  ;;  %v2030_v35 = vld [vmem:[%s3270_s1 + $0x64] sm:$0xf]  ;;  %v2696_v43 = vor.u32 %v2017_v26, %v1364_v25 }
  0x34   :  { %902 = vmatpush.bf16.msrb.mxu0 %v1653_v36  ;;  %v1422_v36 = vld [vmem:[%s3270_s1 + $0x68] sm:$0xf0]  ;;  %v2062_v41 = vld [vmem:[%s3270_s1 + $0x164] sm:$0xf]  ;;  %v2698_v44 = vor.u32 %v2012_v27, %v1358_v30  ;;  %v2706_v47 = vor.u32 %v2013_v31, %v1366_v32  ;;  %v1414_v52 = vld [vmem:[%s3270_s1 + $0x58] sm:$0xf0] }
  0x35   :  { %916 = vmatpush.bf16.msrb.mxu1 %v1717_v37  ;;  %v2046_v37 = vld [vmem:[%s3270_s1 + $0xe4] sm:$0xf]  ;;  %v1486_v40 = vld [vmem:[%s3270_s1 + $0xe8] sm:$0xf0]  ;;  %v2044_v53 = vld [vmem:[%s3270_s1 + $0xd4] sm:$0xf] }
  0x36   :  { %930 = vmatpush.bf16.msrb.mxu2 %v1781_v38  ;;  %v1625_v38 = vor.u32 %v2080_v18, %v1622_v20  ;;  %v2078_v45 = vld [vmem:[%s3270_s1 + $0x1e4] sm:$0xf]  ;;  %v1614_v46 = vld [vmem:[%s3270_s1 + $0x1e8] sm:$0xf0]  ;;  %v1489_v49 = vor.u32 %v2046_v37, %v1486_v40  ;;  %v2060_v56 = vld [vmem:[%s3270_s1 + $0x154] sm:$0xf] }
  0x37   :  { %944 = vmatpush.bf16.msrb.mxu3 %v1845_v42  ;;  %v1550_v42 = vld [vmem:[%s3270_s1 + $0x168] sm:$0xf0]  ;;  %v1617_v54 = vor.u32 %v2078_v45, %v1614_v46  ;;  %v1542_v57 = vld [vmem:[%s3270_s1 + $0x158] sm:$0xf0]  ;;  %v2076_v59 = vld [vmem:[%s3270_s1 + $0x1d4] sm:$0xf] }
  0x38   :  { %903 = vmatpush.bf16.msrb.mxu0 %v1645_v48  ;;  %v1425_v48 = vor.u32 %v2030_v35, %v1422_v36  ;;  %v1606_v60 = vld [vmem:[%s3270_s1 + $0x1d8] sm:$0xf0]  ;;  %v2026_v0 = vld [vmem:[%s3270_s1 + $0x44] sm:$0xf]  ;;  %v1406_v2 = vld [vmem:[%s3270_s1 + $0x48] sm:$0xf0] }
  0x39   :  { %917 = vmatpush.bf16.msrb.mxu1 %v1709_v50  ;;  %v1553_v50 = vor.u32 %v2062_v41, %v1550_v42  ;;  %v2042_v3 = vld [vmem:[%s3270_s1 + $0xc4] sm:$0xf]  ;;  %v1609_v4 = vor.u32 %v2076_v59, %v1606_v60  ;;  %v1534_v7 = vld [vmem:[%s3270_s1 + $0x148] sm:$0xf0]  ;;  %v2024_v14 = vld [vmem:[%s3270_s1 + $0x34] sm:$0xf] }
  0x3a   :  { %931 = vmatpush.bf16.msrb.mxu2 %v1773_v51  ;;  %v2028_v51 = vld [vmem:[%s3270_s1 + $0x54] sm:$0xf]  ;;  %v2074_v8 = vld [vmem:[%s3270_s1 + $0x1c4] sm:$0xf]  ;;  %v1598_v9 = vld [vmem:[%s3270_s1 + $0x1c8] sm:$0xf0] }
  0x3b   :  { %945 = vmatpush.bf16.msrb.mxu3 %v1837_v55  ;;  %v1478_v55 = vld [vmem:[%s3270_s1 + $0xd8] sm:$0xf0]  ;;  %v1417_v61 = vor.u32 %v2028_v51, %v1414_v52  ;;  %v2040_v16 = vld [vmem:[%s3270_s1 + $0xb4] sm:$0xf]  ;;  %v1601_v18 = vor.u32 %v2074_v8, %v1598_v9  ;;  %v2022_v27 = vld [vmem:[%s3270_s1 + $0x24] sm:$0xf] }
  0x3c   :  { %904 = vmatpush.bf16.msrb.mxu0 %v1637_v63  ;;  %v1481_v62 = vor.u32 %v2044_v53, %v1478_v55  ;;  %v1545_v63 = vor.u32 %v2060_v56, %v1542_v57  ;;  %v1398_v15 = vld [vmem:[%s3270_s1 + $0x38] sm:$0xf0]  ;;  %v2056_v20 = vld [vmem:[%s3270_s1 + $0x134] sm:$0xf]  ;;  %v1454_v31 = vld [vmem:[%s3270_s1 + $0xa8] sm:$0xf0] }
  0x3d   :  { %918 = vmatpush.bf16.msrb.mxu1 %v1701_v5  ;;  %v1470_v5 = vld [vmem:[%s3270_s1 + $0xc8] sm:$0xf0]  ;;  %v1526_v21 = vld [vmem:[%s3270_s1 + $0x138] sm:$0xf0]  ;;  %v2072_v22 = vld [vmem:[%s3270_s1 + $0x1b4] sm:$0xf] }
  0x3e   :  { %932 = vmatpush.bf16.msrb.mxu2 %v1765_v6  ;;  %v2058_v6 = vld [vmem:[%s3270_s1 + $0x144] sm:$0xf]  ;;  %v1473_v12 = vor.u32 %v2042_v3, %v1470_v5  ;;  %v1529_v26 = vor.u32 %v2056_v20, %v1526_v21  ;;  %v1582_v35 = vld [vmem:[%s3270_s1 + $0x1a8] sm:$0xf0]  ;;  %v2020_v40 = vld [vmem:[%s3270_s1 + $0x14] sm:$0xf] }
  0x3f   :  { %946 = vmatpush.bf16.msrb.mxu3 %v1829_v11  ;;  %v1409_v11 = vor.u32 %v2026_v0, %v1406_v2  ;;  %v1537_v13 = vor.u32 %v2058_v6, %v1534_v7  ;;  %v2054_v32 = vld [vmem:[%s3270_s1 + $0x124] sm:$0xf]  ;;  %v1382_v41 = vld [vmem:[%s3270_s1 + $0x18] sm:$0xf0]  ;;  %v2036_v42 = vld [vmem:[%s3270_s1 + $0x94] sm:$0xf] }
  0x40   :  { %905 = vmatpush.bf16.msrb.mxu0 %v1629_v19  ;;  %v1462_v19 = vld [vmem:[%s3270_s1 + $0xb8] sm:$0xf0]  ;;  %v1385_v52 = vor.u32 %v2020_v40, %v1382_v41  ;;  %v2018_v53 = vld [vmem:[%s3270_s1 + $0x4] sm:$0xf]  ;;  %v1438_v59 = vld [vmem:[%s3270_s1 + $0x88] sm:$0xf0] }
  0x41   :  { %919 = vmatpush.bf16.msrb.mxu1 %v1693_v23  ;;  %v1590_v23 = vld [vmem:[%s3270_s1 + $0x1b8] sm:$0xf0]  ;;  %v1465_v25 = vor.u32 %v2040_v16, %v1462_v19  ;;  %v2034_v57 = vld [vmem:[%s3270_s1 + $0x84] sm:$0xf]  ;;  %v1566_v0 = vld [vmem:[%s3270_s1 + $0x188] sm:$0xf0] }
  0x42   :  { %933 = vmatpush.bf16.msrb.mxu2 %v1757_v24  ;;  %v1401_v24 = vor.u32 %v2024_v14, %v1398_v15  ;;  %v1593_v30 = vor.u32 %v2072_v22, %v1590_v23  ;;  %v1446_v46 = vld [vmem:[%s3270_s1 + $0x98] sm:$0xf0]  ;;  %v2050_v60 = vld [vmem:[%s3270_s1 + $0x104] sm:$0xf]  ;;  %v2096_v2 = vld [vmem:[%s3270_s1 + $0x274] sm:$0xf]  ;;  %v1441_v9 = vor.u32 %v2034_v57, %v1438_v59 }
  0x43   :  { %947 = vmatpush.bf16.msrb.mxu3 %v1821_v28  ;;  %906 = vmatmul.bf16.vlgmr.msrb.gmra.mxu0 %v2685_v39  ;;  %v1390_v28 = vld [vmem:[%s3270_s1 + $0x28] sm:$0xf0]  ;;  %v1574_v51 = vld [vmem:[%s3270_s1 + $0x198] sm:$0xf0]  ;;  %v1449_v55 = vor.u32 %v2036_v42, %v1446_v46  ;;  %v2128_v7 = vld [vmem:[%s3270_s1 + $0x374] sm:$0xf] }
  0x44   :  { %954 = vmatpush.bf16.msra.mxu0 %v1433_v29  ;;  %920 = vmatmul.bf16.vlgmr.msrb.gmra.mxu1 %v2698_v44  ;;  %v2038_v29 = vld [vmem:[%s3270_s1 + $0xa4] sm:$0xf]  ;;  %v1393_v36 = vor.u32 %v2022_v27, %v1390_v28  ;;  %v1686_v3 = vld [vmem:[%s3270_s1 + $0x278] sm:$0xf0]  ;;  %v1678_v20 = vld [vmem:[%s3270_s1 + $0x268] sm:$0xf0] }
  0x45   :  { %968 = vmatpush.bf16.msra.mxu1 %v1497_v33  ;;  %934 = vmatmul.bf16.vlgmr.msrb.gmra.mxu2 %v2696_v43  ;;  %v1518_v33 = vld [vmem:[%s3270_s1 + $0x128] sm:$0xf0]  ;;  %v1457_v37 = vor.u32 %v2038_v29, %v1454_v31  ;;  %v1750_v6 = vld [vmem:[%s3270_s1 + $0x2f8] sm:$0xf0]  ;;  %v1689_v15 = vor.u32 %v2096_v2, %v1686_v3  ;;  %v2094_v19 = vld [vmem:[%s3270_s1 + $0x264] sm:$0xf] }
  0x46   :  { %982 = vmatpush.bf16.msra.mxu2 %v1561_v34  ;;  %948 = vmatmul.bf16.vlgmr.msrb.gmra.mxu3 %v2706_v47  ;;  %v2070_v34 = vld [vmem:[%s3270_s1 + $0x1a4] sm:$0xf]  ;;  %v1814_v8 = vld [vmem:[%s3270_s1 + $0x378] sm:$0xf0]  ;;  %v1742_v23 = vld [vmem:[%s3270_s1 + $0x2e8] sm:$0xf0]  ;;  %v1681_v28 = vor.u32 %v2094_v19, %v1678_v20 }
  0x47   :  { %996 = vmatpush.bf16.msra.mxu3 %v1625_v38  ;;  %v1521_v38 = vor.u32 %v2054_v32, %v1518_v33  ;;  %v1585_v45 = vor.u32 %v2070_v34, %v1582_v35  ;;  %v2110_v21 = vld [vmem:[%s3270_s1 + $0x2e4] sm:$0xf]  ;;  %v1870_v27 = vld [vmem:[%s3270_s1 + $0x3e8] sm:$0xf0]  ;;  %v2092_v31 = vld [vmem:[%s3270_s1 + $0x254] sm:$0xf] }
  0x48   :  { %955 = vmatpush.bf16.msra.mxu0 %v1425_v48  ;;  %v2052_v48 = vld [vmem:[%s3270_s1 + $0x114] sm:$0xf]  ;;  %v1745_v29 = vor.u32 %v2110_v21, %v1742_v23  ;;  %v1670_v32 = vld [vmem:[%s3270_s1 + $0x258] sm:$0xf0]  ;;  %v1662_v46 = vld [vmem:[%s3270_s1 + $0x248] sm:$0xf0] }
  0x49   :  { %969 = vmatpush.bf16.msra.mxu1 %v1489_v49  ;;  %v1510_v49 = vld [vmem:[%s3270_s1 + $0x118] sm:$0xf0]  ;;  %v2108_v33 = vld [vmem:[%s3270_s1 + $0x2d4] sm:$0xf]  ;;  %v1673_v40 = vor.u32 %v2092_v31, %v1670_v32  ;;  %v2082_v31 = vld [vmem:[%s3270_s1 + $0x204] sm:$0xf] }
  0x4a   :  { %983 = vmatpush.bf16.msra.mxu2 %v1553_v50  ;;  %v2068_v50 = vld [vmem:[%s3270_s1 + $0x194] sm:$0xf]  ;;  %v1513_v56 = vor.u32 %v2052_v48, %v1510_v49  ;;  %v1734_v35 = vld [vmem:[%s3270_s1 + $0x2d8] sm:$0xf0]  ;;  %v2122_v48 = vld [vmem:[%s3270_s1 + $0x344] sm:$0xf] }
  0x4b   :  { %997 = vmatpush.bf16.msra.mxu3 %v1617_v54  ;;  %v1374_v54 = vld [vmem:[%s3270_s1 + $0x8] sm:$0xf0]  ;;  %v1737_v41 = vor.u32 %v2108_v33, %v1734_v35  ;;  %v2104_v57 = vld [vmem:[%s3270_s1 + $0x2b4] sm:$0xf]  ;;  %v1638_v20 = vld [vmem:[%s3270_s1 + $0x218] sm:$0xf0] }
  0x4c   :  { %956 = vmatpush.bf16.msra.mxu0 %v1417_v61  ;;  %v1577_v61 = vor.u32 %v2068_v50, %v1574_v51  ;;  %v1377_v5 = vor.u32 %v2018_v53, %v1374_v54  ;;  %v1790_v49 = vld [vmem:[%s3270_s1 + $0x348] sm:$0xf0]  ;;  %v2138_v50 = vld [vmem:[%s3270_s1 + $0x3c4] sm:$0xf]  ;;  %v2084_v19 = vld [vmem:[%s3270_s1 + $0x214] sm:$0xf] }
  0x4d   :  { %970 = vmatpush.bf16.msra.mxu1 %v1481_v62  ;;  %v1502_v62 = vld [vmem:[%s3270_s1 + $0x108] sm:$0xf0]  ;;  %v1793_v54 = vor.u32 %v2122_v48, %v1790_v49  ;;  %v2100_v21 = vld [vmem:[%s3270_s1 + $0x294] sm:$0xf]  ;;  %v1702_v23 = vld [vmem:[%s3270_s1 + $0x298] sm:$0xf0] }
  0x4e   :  { %984 = vmatpush.bf16.msra.mxu2 %v1545_v63  ;;  %v2066_v63 = vld [vmem:[%s3270_s1 + $0x184] sm:$0xf]  ;;  %v1854_v51 = vld [vmem:[%s3270_s1 + $0x3c8] sm:$0xf0] }
  0x4f   :  { %998 = vmatpush.bf16.msra.mxu3 %v1609_v4  ;;  %v2112_v4 = vld [vmem:[%s3270_s1 + $0x2f4] sm:$0xf]  ;;  %v1569_v14 = vor.u32 %v2066_v63, %v1566_v0  ;;  %v1857_v59 = vor.u32 %v2138_v50, %v1854_v51  ;;  %v1846_v0 = vld [vmem:[%s3270_s1 + $0x3b8] sm:$0xf0]  ;;  %v1630_v32 = vld [vmem:[%s3270_s1 + $0x208] sm:$0xf0] }
  0x50   :  { %957 = vmatpush.bf16.msra.mxu0 %v1409_v11  ;;  %v1505_v11 = vor.u32 %v2050_v60, %v1502_v62  ;;  %v1753_v16 = vor.u32 %v2112_v4, %v1750_v6  ;;  %v1718_v60 = vld [vmem:[%s3270_s1 + $0x2b8] sm:$0xf0]  ;;  %v2136_v63 = vld [vmem:[%s3270_s1 + $0x3b4] sm:$0xf]  ;;  %v1646_v6 = vld [vmem:[%s3270_s1 + $0x228] sm:$0xf0] }
  0x51   :  { %971 = vmatpush.bf16.msra.mxu1 %v1473_v12  ;;  %v2144_v12 = vld [vmem:[%s3270_s1 + $0x3f4] sm:$0xf]  ;;  %v1782_v62 = vld [vmem:[%s3270_s1 + $0x338] sm:$0xf0]  ;;  %v1721_v3 = vor.u32 %v2104_v57, %v1718_v60  ;;  %v2098_v33 = vld [vmem:[%s3270_s1 + $0x284] sm:$0xf] }
  0x52   :  { %985 = vmatpush.bf16.msra.mxu2 %v1537_v13  ;;  %v1878_v13 = vld [vmem:[%s3270_s1 + $0x3f8] sm:$0xf0]  ;;  %v1694_v35 = vld [vmem:[%s3270_s1 + $0x288] sm:$0xf0]  ;;  %v2158_v48 = vld [vmem:[%s3272_s3 + $0x64] sm:$0xf] }
  0x53   :  { %999 = vmatpush.bf16.msra.mxu3 %v1601_v18  ;;  %v1817_v18 = vor.u32 %v2128_v7, %v1814_v8  ;;  %v1881_v22 = vor.u32 %v2144_v12, %v1878_v13  ;;  %v2102_v7 = vld [vmem:[%s3270_s1 + $0x2a4] sm:$0xf]  ;;  %v1849_v8 = vor.u32 %v2136_v63, %v1846_v0  ;;  %v1774_v12 = vld [vmem:[%s3270_s1 + $0x328] sm:$0xf0]  ;;  %v2155_v60 = vld [vmem:[%s3272_s3 + $0x44] sm:$0xf0] }
  0x54   :  { %958 = vmatpush.bf16.msra.mxu0 %v1401_v24  ;;  %v2126_v24 = vld [vmem:[%s3270_s1 + $0x364] sm:$0xf]  ;;  %v1934_v49 = vld [vmem:[%s3272_s3 + $0x68] sm:$0xf0] }
  0x55   :  { %972 = vmatpush.bf16.msra.mxu1 %v1465_v25  ;;  %v1806_v25 = vld [vmem:[%s3270_s1 + $0x368] sm:$0xf0]  ;;  %v2134_v13 = vld [vmem:[%s3270_s1 + $0x3a4] sm:$0xf]  ;;  %v1937_v51 = vor.u32 %v2158_v48, %v1934_v49 }
  0x56   :  { %986 = vmatpush.bf16.msra.mxu2 %v1529_v26  ;;  %v2142_v26 = vld [vmem:[%s3270_s1 + $0x3e4] sm:$0xf]  ;;  %v1918_v63 = vld [vmem:[%s3272_s3 + $0x48] sm:$0xf0] }
  0x57   :  { %1000 = vmatpush.bf16.msra.mxu3 %v1593_v30  ;;  %v1809_v30 = vor.u32 %v2126_v24, %v1806_v25  ;;  %v1873_v34 = vor.u32 %v2142_v26, %v1870_v27  ;;  %v2116_v24 = vld [vmem:[%s3270_s1 + $0x314] sm:$0xf]  ;;  %v1766_v25 = vld [vmem:[%s3270_s1 + $0x318] sm:$0xf0] }
  0x58   :  { %959 = vmatpush.bf16.msra.mxu0 %v1393_v36  ;;  %v2124_v36 = vld [vmem:[%s3270_s1 + $0x354] sm:$0xf]  ;;  %v1830_v27 = vld [vmem:[%s3270_s1 + $0x398] sm:$0xf0] }
  0x59   :  { %973 = vmatpush.bf16.msra.mxu1 %v1457_v37  ;;  %v1798_v37 = vld [vmem:[%s3270_s1 + $0x358] sm:$0xf0]  ;;  %v2132_v26 = vld [vmem:[%s3270_s1 + $0x394] sm:$0xf] }
  0x5a   :  { %987 = vmatpush.bf16.msra.mxu2 %v1521_v38  ;;  %v2140_v38 = vld [vmem:[%s3270_s1 + $0x3d4] sm:$0xf]  ;;  %v1801_v42 = vor.u32 %v2124_v36, %v1798_v37  ;;  %v2114_v36 = vld [vmem:[%s3270_s1 + $0x304] sm:$0xf]  ;;  %v1758_v37 = vld [vmem:[%s3270_s1 + $0x308] sm:$0xf0] }
  0x5b   :  { %1001 = vmatpush.bf16.msra.mxu3 %v1585_v45  ;;  %v2090_v45 = vld [vmem:[%s3270_s1 + $0x244] sm:$0xf] }
  0x5c   :  { %960 = vmatpush.bf16.msra.mxu0 %v1385_v52  ;;  %v1665_v52 = vor.u32 %v2090_v45, %v1662_v46  ;;  %v1940_v46 = vld [vmem:[%s3272_s3 + $0x70] sm:$0xf] }
  0x5d   :  { %974 = vmatpush.bf16.msra.mxu1 %v1449_v55  ;;  %v2088_v55 = vld [vmem:[%s3270_s1 + $0x234] sm:$0xf] }
  0x5e   :  { %988 = vmatpush.bf16.msra.mxu2 %v1513_v56  ;;  %v1654_v56 = vld [vmem:[%s3270_s1 + $0x238] sm:$0xf0] }
  0x5f   :  { %1002 = vmatpush.bf16.msra.mxu3 %v1577_v61  ;;  %v2120_v61 = vld [vmem:[%s3270_s1 + $0x334] sm:$0xf]  ;;  %v1657_v2 = vor.u32 %v2088_v55, %v1654_v56  ;;  %v1926_v56 = vld [vmem:[%s3272_s3 + $0x58] sm:$0xf0] }
  0x60   :  { %961 = vmatpush.bf16.msra.mxu0 %v1377_v5  ;;  %v1785_v4 = vor.u32 %v2120_v61, %v1782_v62  ;;  %v2086_v5 = vld [vmem:[%s3270_s1 + $0x224] sm:$0xf] }
  0x61   :  { %975 = vmatpush.bf16.msra.mxu1 %v1441_v9  ;;  %v1710_v9 = vld [vmem:[%s3270_s1 + $0x2a8] sm:$0xf0]  ;;  %v2154_v61 = vld [vmem:[%s3272_s3 + $0x44] sm:$0xf] }
  0x62   :  { %989 = vmatpush.bf16.msra.mxu2 %v1505_v11  ;;  %v2118_v11 = vld [vmem:[%s3270_s1 + $0x324] sm:$0xf]  ;;  %v1921_v0 = vor.u32 %v2154_v61, %v1918_v63  ;;  %v1996_v63 = vld [vmem:[%s3272_s3 + $0xe0] sm:$0xf] }
  0x63   :  { %1003 = vmatpush.bf16.msra.mxu3 %v1569_v14  ;;  %962 = vmatmul.bf16.vlgmr.msra.gmra.mxu0 %v2463_v58  ;;  %v2106_v58 = vld [vmem:[%s3270_s1 + $0x2c4] sm:$0xf]  ;;  %v1838_v14 = vld [vmem:[%s3270_s1 + $0x3a8] sm:$0xf0] }
  0x64   :  { %1010 = vmatpush.bf16.msrb.mxu0 %v1689_v15  ;;  %976 = vmatmul.bf16.vlgmr.msra.gmra.mxu1 %v2499_v10  ;;  %v1726_v10 = vld [vmem:[%s3270_s1 + $0x2c8] sm:$0xf0]  ;;  %v1649_v15 = vor.u32 %v2086_v5, %v1646_v6  ;;  %v1910_v6 = vld [vmem:[%s3272_s3 + $0x38] sm:$0xf0] }
  0x65   :  { %1024 = vmatpush.bf16.msrb.mxu1 %v1753_v16  ;;  %990 = vmatmul.bf16.vlgmr.msra.gmra.mxu2 %v2477_v1  ;;  %v1862_v1 = vld [vmem:[%s3270_s1 + $0x3d8] sm:$0xf0]  ;;  %v1729_v53 = vor.u32 %v2106_v58, %v1726_v10  ;;  %v1713_v16 = vor.u32 %v2102_v7, %v1710_v9  ;;  %v2161_v58 = vld [vmem:[%s3272_s3 + $0x74] sm:$0xf0] }
  0x66   :  { %1038 = vmatpush.bf16.msrb.mxu2 %v1817_v18  ;;  %1004 = vmatmul.bf16.vlgmr.msra.gmra.mxu3 %v2513_v17  ;;  %v1865_v17 = vor.u32 %v2140_v38, %v1862_v1  ;;  %v1777_v18 = vor.u32 %v2118_v11, %v1774_v12  ;;  %v2130_v38 = vld [vmem:[%s3270_s1 + $0x384] sm:$0xf]  ;;  %v1822_v1 = vld [vmem:[%s3270_s1 + $0x388] sm:$0xf0]  ;;  %v1941_v10 = vor.u32 %v2161_v58, %v1940_v46  ;;  %v1900_v11 = vld [vmem:[%s3272_s3 + $0x20] sm:$0xf] }
  0x67   :  { %1052 = vmatpush.bf16.msrb.mxu3 %v1881_v22  ;;  %v1841_v22 = vor.u32 %v2134_v13, %v1838_v14  ;;  %v1825_v45 = vor.u32 %v2130_v38, %v1822_v1  ;;  %v2151_v12 = vld [vmem:[%s3272_s3 + $0x24] sm:$0xf0]  ;;  %v2150_v13 = vld [vmem:[%s3272_s3 + $0x24] sm:$0xf] }
  0x68   :  { %1011 = vmatpush.bf16.msrb.mxu0 %v1681_v28  ;;  %v1641_v28 = vor.u32 %v2084_v19, %v1638_v20  ;;  %v1892_v20 = vld [vmem:[%s3272_s3 + $0x10] sm:$0xf] }
  0x69   :  { %1025 = vmatpush.bf16.msrb.mxu1 %v1745_v29  ;;  %v1705_v29 = vor.u32 %v2100_v21, %v1702_v23  ;;  %v2149_v21 = vld [vmem:[%s3272_s3 + $0x14] sm:$0xf0] }
  0x6a   :  { %1039 = vmatpush.bf16.msrb.mxu2 %v1809_v30  ;;  %v1769_v30 = vor.u32 %v2116_v24, %v1766_v25  ;;  %v1893_v23 = vor.u32 %v2149_v21, %v1892_v20  ;;  %v1894_v24 = vld [vmem:[%s3272_s3 + $0x18] sm:$0xf0]  ;;  %v1980_v20 = vld [vmem:[%s3272_s3 + $0xc0] sm:$0xf]  ;;  %v2171_v21 = vld [vmem:[%s3272_s3 + $0xc4] sm:$0xf0] }
  0x6b   :  { %1053 = vmatpush.bf16.msrb.mxu3 %v1873_v34  ;;  %v1833_v34 = vor.u32 %v2132_v26, %v1830_v27 }
  0x6c   :  { %1012 = vmatpush.bf16.msrb.mxu0 %v1673_v40  ;;  %v1633_v40 = vor.u32 %v2082_v31, %v1630_v32  ;;  %v2146_v31 = vld [vmem:[%s3272_s3 + $0x4] sm:$0xf] }
  0x6d   :  { %1026 = vmatpush.bf16.msrb.mxu1 %v1737_v41  ;;  %v1697_v41 = vor.u32 %v2098_v33, %v1694_v35  ;;  %v1886_v33 = vld [vmem:[%s3272_s3 + $0x8] sm:$0xf0] }
  0x6e   :  { %1040 = vmatpush.bf16.msrb.mxu2 %v1801_v42  ;;  %v1761_v42 = vor.u32 %v2114_v36, %v1758_v37  ;;  %v1889_v35 = vor.u32 %v2146_v31, %v1886_v33  ;;  %v2167_v33 = vld [vmem:[%s3272_s3 + $0xa4] sm:$0xf0] }
  0x6f   :  { %1054 = vmatpush.bf16.msrb.mxu3 %v1865_v17  ;;  %v2160_v17 = vld [vmem:[%s3272_s3 + $0x74] sm:$0xf] }
  0x70   :  { %1013 = vmatpush.bf16.msrb.mxu0 %v1665_v52  ;;  %v1924_v52 = vld [vmem:[%s3272_s3 + $0x50] sm:$0xf] }
  0x71   :  { %1027 = vmatpush.bf16.msrb.mxu1 %v1729_v53  ;;  %v2157_v53 = vld [vmem:[%s3272_s3 + $0x54] sm:$0xf0] }
  0x72   :  { %1041 = vmatpush.bf16.msrb.mxu2 %v1793_v54  ;;  %v2156_v54 = vld [vmem:[%s3272_s3 + $0x54] sm:$0xf]  ;;  %v1925_v55 = vor.u32 %v2157_v53, %v1924_v52 }
  0x73   :  { %1055 = vmatpush.bf16.msrb.mxu3 %v1857_v59  ;;  %v1929_v57 = vor.u32 %v2156_v54, %v1926_v56  ;;  %v1916_v59 = vld [vmem:[%s3272_s3 + $0x40] sm:$0xf]  ;;  %v2004_v54 = vld [vmem:[%s3272_s3 + $0xf0] sm:$0xf]  ;;  %v2176_v56 = vld [vmem:[%s3272_s3 + $0xf4] sm:$0xf] }
  0x74   :  { %1014 = vmatpush.bf16.msrb.mxu0 %v1657_v2  ;;  %v1917_v62 = vor.u32 %v2155_v60, %v1916_v59  ;;  %v1908_v2 = vld [vmem:[%s3272_s3 + $0x30] sm:$0xf] }
  0x75   :  { %1028 = vmatpush.bf16.msrb.mxu1 %v1721_v3  ;;  %v2153_v3 = vld [vmem:[%s3272_s3 + $0x34] sm:$0xf0] }
  0x76   :  { %1042 = vmatpush.bf16.msrb.mxu2 %v1785_v4  ;;  %v2152_v4 = vld [vmem:[%s3272_s3 + $0x34] sm:$0xf]  ;;  %v1909_v5 = vor.u32 %v2153_v3, %v1908_v2  ;;  %v2174_v3 = vld [vmem:[%s3272_s3 + $0xe4] sm:$0xf] }
  0x77   :  { %1056 = vmatpush.bf16.msrb.mxu3 %v1849_v8  ;;  %v1913_v7 = vor.u32 %v2152_v4, %v1910_v6  ;;  %v3119_v8 = vld [vmem:[%s3273_s2] sm:$0x3]  ;;  %v1998_v4 = vld [vmem:[%s3272_s3 + $0xe8] sm:$0xf0] }
  0x78   :  { %1015 = vmatpush.bf16.msrb.mxu0 %v1649_v15  ;;  %v1901_v15 = vor.u32 %v2151_v12, %v1900_v11  ;;  %v158_v19 = vperm.slane %v3119_v8, 0 }
  0x79   :  { %1029 = vmatpush.bf16.msrb.mxu1 %v1713_v16  ;;  %v1902_v16 = vld [vmem:[%s3272_s3 + $0x28] sm:$0xf0] }
  0x7a   :  { %1043 = vmatpush.bf16.msrb.mxu2 %v1777_v18  ;;  %v1905_v18 = vor.u32 %v2150_v13, %v1902_v16  ;;  %v1988_v13 = vld [vmem:[%s3272_s3 + $0xd0] sm:$0xf] }
  0x7b   :  { %1057 = vmatpush.bf16.msrb.mxu3 %v1841_v22  ;;  %v2148_v22 = vld [vmem:[%s3272_s3 + $0x14] sm:$0xf] }
  0x7c   :  { %1016 = vmatpush.bf16.msrb.mxu0 %v1641_v28  ;;  %v1897_v25 = vor.u32 %v2148_v22, %v1894_v24  ;;  %v2170_v22 = vld [vmem:[%s3272_s3 + $0xc4] sm:$0xf]  ;;  %v1982_v24 = vld [vmem:[%s3272_s3 + $0xc8] sm:$0xf0] }
  0x7d   :  { %1030 = vmatpush.bf16.msrb.mxu1 %v1705_v29  ;;  %v1884_v29 = vld [vmem:[%s3272_s3] sm:$0xf] }
  0x7e   :  { %1044 = vmatpush.bf16.msrb.mxu2 %v1769_v30  ;;  %v2147_v30 = vld [vmem:[%s3272_s3 + $0x4] sm:$0xf0] }
  0x7f   :  { %1058 = vmatpush.bf16.msrb.mxu3 %v1833_v34  ;;  %v1885_v32 = vor.u32 %v2147_v30, %v1884_v29  ;;  %v1974_v30 = vld [vmem:[%s3272_s3 + $0xb8] sm:$0xf0] }
  0x80   :  { %1017 = vmatpush.bf16.msrb.mxu0 %v1633_v40 }
  0x81   :  { %1031 = vmatpush.bf16.msrb.mxu1 %v1697_v41 }
  0x82   :  { %1045 = vmatpush.bf16.msrb.mxu2 %v1761_v42 }
  0x83   :  { %1059 = vmatpush.bf16.msrb.mxu3 %v1825_v45  ;;  %1018 = vmatmul.bf16.vlgmr.msrb.gmra.mxu0 %v2685_v39  ;;  %v1942_v39 = vld [vmem:[%s3272_s3 + $0x78] sm:$0xf0] }
  0x84   :  { %1032 = vmatmul.bf16.vlgmr.msrb.gmra.mxu1 %v2698_v44  ;;  %v2159_v44 = vld [vmem:[%s3272_s3 + $0x64] sm:$0xf0]  ;;  %1270 = vmatpush.bf16.msra.mxu0 %v1941_v10 }
  0x85   :  { %1046 = vmatmul.bf16.vlgmr.msrb.gmra.mxu2 %v2696_v43  ;;  %v1932_v43 = vld [vmem:[%s3272_s3 + $0x60] sm:$0xf] }
  0x86   :  { %1060 = vmatmul.bf16.vlgmr.msrb.gmra.mxu3 %v2706_v47  ;;  %v1945_v47 = vor.u32 %v2160_v17, %v1942_v39  ;;  %v1933_v50 = vor.u32 %v2159_v44, %v1932_v43 }
  0x88   :  { %1298 = vmatpush.bf16.msra.mxu2 %v1945_v47  ;;  %1271 = vmatpush.bf16.msra.mxu0 %v1933_v50 }
  0x8c   :  { %1299 = vmatpush.bf16.msra.mxu2 %v1937_v51  ;;  %1272 = vmatpush.bf16.msra.mxu0 %v1925_v55  ;;  %v2177_v55 = vld [vmem:[%s3272_s3 + $0xf4] sm:$0xf0] }
  0x8d   :  { %v2005_v61 = vor.u32 %v2177_v55, %v2004_v54 }
  0x8f   :  { %1284 = vmatpush.bf16.msra.mxu1 %v2005_v61 }
  0x90   :  { %1300 = vmatpush.bf16.msra.mxu2 %v1929_v57  ;;  %1273 = vmatpush.bf16.msra.mxu0 %v1917_v62  ;;  %v2006_v62 = vld [vmem:[%s3272_s3 + $0xf8] sm:$0xf0] }
  0x91   :  { %v2009_v2 = vor.u32 %v2176_v56, %v2006_v62 }
  0x93   :  { %1312 = vmatpush.bf16.msra.mxu3 %v2009_v2 }
  0x94   :  { %1301 = vmatpush.bf16.msra.mxu2 %v1921_v0  ;;  %1274 = vmatpush.bf16.msra.mxu0 %v1909_v5  ;;  %v2175_v0 = vld [vmem:[%s3272_s3 + $0xe4] sm:$0xf0] }
  0x95   :  { %v1997_v6 = vor.u32 %v2175_v0, %v1996_v63 }
  0x97   :  { %1285 = vmatpush.bf16.msra.mxu1 %v1997_v6 }
  0x98   :  { %1302 = vmatpush.bf16.msra.mxu2 %v1913_v7  ;;  %1275 = vmatpush.bf16.msra.mxu0 %v1901_v15  ;;  %v2001_v7 = vor.u32 %v2174_v3, %v1998_v4  ;;  %v2172_v15 = vld [vmem:[%s3272_s3 + $0xd4] sm:$0xf] }
  0x9a   :  { %1313 = vmatpush.bf16.msra.mxu3 %v2001_v7 }
  0x9c   :  { %1303 = vmatpush.bf16.msra.mxu2 %v1905_v18  ;;  %1276 = vmatpush.bf16.msra.mxu0 %v1893_v23  ;;  %v1990_v18 = vld [vmem:[%s3272_s3 + $0xd8] sm:$0xf0]  ;;  %v1981_v23 = vor.u32 %v2171_v21, %v1980_v20 }
  0xa0   :  { %v851_v9 = vpop.f32.mrf.mxu0  ;;  %1304 = vmatpush.bf16.msra.mxu2 %v1897_v25  ;;  %1277 = vmatpush.bf16.msra.mxu0 %v1885_v32  ;;  %v1985_v25 = vor.u32 %v2170_v22, %v1982_v24  ;;  %v1964_v32 = vld [vmem:[%s3272_s3 + $0xa0] sm:$0xf] }
  0xa1   :  { %v865_v14 = vpop.f32.mrf.mxu1  ;;  %v852_v27 = vadd.f32 %v851_v9, %v158_v19  ;;  %v1104_v22 = vld [vmem:[%s3274_s4] sm:$0x3] }
  0xa2   :  { %v1106_v24 = vperm.slane %v1104_v22, 0 }
  0xa3   :  { %v866_v37 = vadd.f32 %v865_v14, %v852_v27  ;;  %v2173_v14 = vld [vmem:[%s3272_s3 + $0xd4] sm:$0xf0] }
  0xa4   :  { %1305 = vmatpush.bf16.msra.mxu2 %v1889_v35  ;;  %v1989_v16 = vor.u32 %v2173_v14, %v1988_v13  ;;  %v2169_v27 = vld [vmem:[%s3272_s3 + $0xb4] sm:$0xf0]  ;;  %v1965_v35 = vor.u32 %v2167_v33, %v1964_v32 }
  0xa6   :  { %1286 = vmatpush.bf16.msra.mxu1 %v1989_v16 }
  0xa8   :  { %v879_v26 = vpop.f32.mrf.mxu2  ;;  %v853_v34 = vpop.f32.mrf.mxu0 }
  0xa9   :  { %v893_v28 = vpop.f32.mrf.mxu3  ;;  %v867_v36 = vpop.f32.mrf.mxu1  ;;  %v854_v38 = vadd.f32 %v853_v34, %v158_v19  ;;  %v880_v1 = vadd.f32 %v879_v26, %v866_v37  ;;  %v1993_v19 = vor.u32 %v2172_v15, %v1990_v18  ;;  %v1972_v26 = vld [vmem:[%s3272_s3 + $0xb0] sm:$0xf]  ;;  %v2166_v34 = vld [vmem:[%s3272_s3 + $0xa4] sm:$0xf] }
  0xaa   :  { %1287 = vmatpush.bf16.msra.mxu1 %v1981_v23  ;;  %v1973_v29 = vor.u32 %v2169_v27, %v1972_v26 }
  0xab   :  { %v868_v41 = vadd.f32 %v867_v36, %v854_v38  ;;  %v894_v45 = vadd.f32 %v893_v28, %v880_v1  ;;  %1314 = vmatpush.bf16.msra.mxu3 %v1993_v19  ;;  %v2168_v28 = vld [vmem:[%s3272_s3 + $0xb4] sm:$0xf]  ;;  %v1966_v36 = vld [vmem:[%s3272_s3 + $0xa8] sm:$0xf0]  ;;  %v1956_v1 = vld [vmem:[%s3272_s3 + $0x90] sm:$0xf] }
  0xac   :  { %v1977_v31 = vor.u32 %v2168_v28, %v1974_v30  ;;  %v1969_v37 = vor.u32 %v2166_v34, %v1966_v36  ;;  %v1107_v28 = vperm.slane %v1104_v22, 1 }
  0xae   :  { %1288 = vmatpush.bf16.msra.mxu1 %v1973_v29 }
  0xaf   :  { %1315 = vmatpush.bf16.msra.mxu3 %v1985_v25 }
  0xb0   :  { %v881_v40 = vpop.f32.mrf.mxu2 }
  0xb1   :  { %v895_v42 = vpop.f32.mrf.mxu3  ;;  %v882_v17 = vadd.f32 %v881_v40, %v868_v41  ;;  %v2165_v40 = vld [vmem:[%s3272_s3 + $0x94] sm:$0xf0]  ;;  %v2164_v41 = vld [vmem:[%s3272_s3 + $0x94] sm:$0xf] }
  0xb2   :  { %1289 = vmatpush.bf16.msra.mxu1 %v1965_v35 }
  0xb3   :  { %v896_v39 = vadd.f32 %v895_v42, %v882_v17  ;;  %1316 = vmatpush.bf16.msra.mxu3 %v1977_v31  ;;  %v1957_v42 = vor.u32 %v2165_v40, %v1956_v1  ;;  %v1948_v17 = vld [vmem:[%s3272_s3 + $0x80] sm:$0xf] }
  0xb6   :  { %1290 = vmatpush.bf16.msra.mxu1 %v1957_v42 }
  0xb7   :  { %1317 = vmatpush.bf16.msra.mxu3 %v1969_v37 }
  0xc0   :  { %v907_v46 = vpop.f32.mrf.mxu0 }
  0xc1   :  { %v921_v58 = vpop.f32.mrf.mxu1  ;;  %v908_v10 = vadd.f32 %v907_v46, %v894_v45  ;;  %v1958_v45 = vld [vmem:[%s3272_s3 + $0x98] sm:$0xf0] }
  0xc3   :  { %v922_v44 = vadd.f32 %v921_v58, %v908_v10  ;;  %v1961_v58 = vor.u32 %v2164_v41, %v1958_v45  ;;  %v2163_v10 = vld [vmem:[%s3272_s3 + $0x84] sm:$0xf0] }
  0xc5   :  { %1318 = vmatpush.bf16.msra.mxu3 %v1961_v58 }
  0xc8   :  { %v935_v43 = vpop.f32.mrf.mxu2  ;;  %v909_v47 = vpop.f32.mrf.mxu0 }
  0xc9   :  { %v949_v48 = vpop.f32.mrf.mxu3  ;;  %v910_v49 = vadd.f32 %v909_v47, %v896_v39  ;;  %v923_v50 = vpop.f32.mrf.mxu1  ;;  %v936_v51 = vadd.f32 %v935_v43, %v922_v44  ;;  %v2162_v39 = vld [vmem:[%s3272_s3 + $0x84] sm:$0xf]  ;;  %v159_v43 = vperm.slane %v3119_v8, 1  ;;  %v1949_v44 = vor.u32 %v2163_v10, %v1948_v17  ;;  %v1950_v47 = vld [vmem:[%s3272_s3 + $0x88] sm:$0xf0] }
  0xcb   :  { %v924_v52 = vadd.f32 %v923_v50, %v910_v49  ;;  %v950_v57 = vadd.f32 %v949_v48, %v936_v51  ;;  %v1953_v49 = vor.u32 %v2162_v39, %v1950_v47  ;;  %1291 = vmatpush.bf16.msra.mxu1 %v1949_v44 }
  0xcd   :  { %v1066_v9 = vmax.f32 %v950_v57, 0.0  ;;  %1319 = vmatpush.bf16.msra.mxu3 %v1953_v49 }
  0xd0   :  { %v937_v53 = vpop.f32.mrf.mxu2 }
  0xd1   :  { %v938_v59 = vadd.f32 %v937_v53, %v924_v52  ;;  %v951_v60 = vpop.f32.mrf.mxu3 }
  0xd3   :  { %v952_v5 = vadd.f32 %v951_v60, %v938_v59 }
  0xd5   :  { %v1068_v11 = vmax.f32 %v952_v5, 0.0 }
  0xd7   :  { %v1070_v12 = vpack.c.bf16 %v1068_v11, %v1066_v9 }
  0xd9   :  { %1278 = vmatmul.bf16.vlgmr.msra.gmra.mxu0 %v1070_v12  ;;  %1306 = vmatmul.bf16.vlgmr.msra.gmra.mxu2 %v1070_v12 }
  0xe0   :  { %v963_v38 = vpop.f32.mrf.mxu0 }
  0xe1   :  { %v977_v46 = vpop.f32.mrf.mxu1  ;;  %v964_v51 = vadd.f32 %v963_v38, %v159_v43 }
  0xe3   :  { %v978_v54 = vadd.f32 %v977_v46, %v964_v51 }
  0xe8   :  { %v991_v48 = vpop.f32.mrf.mxu2  ;;  %v965_v52 = vpop.f32.mrf.mxu0 }
  0xe9   :  { %v1005_v50 = vpop.f32.mrf.mxu3  ;;  %v979_v53 = vpop.f32.mrf.mxu1  ;;  %v966_v55 = vadd.f32 %v965_v52, %v159_v43  ;;  %v992_v57 = vadd.f32 %v991_v48, %v978_v54 }
  0xeb   :  { %v980_v59 = vadd.f32 %v979_v53, %v966_v55  ;;  %v1006_v62 = vadd.f32 %v1005_v50, %v992_v57 }
  0xf0   :  { %v993_v56 = vpop.f32.mrf.mxu2 }
  0xf1   :  { %v1007_v60 = vpop.f32.mrf.mxu3  ;;  %v994_v63 = vadd.f32 %v993_v56, %v980_v59 }
  0xf3   :  { %v1008_v3 = vadd.f32 %v1007_v60, %v994_v63 }
 0x100   :  { %v1019_v8 = vpop.f32.mrf.mxu0 }
 0x101   :  { %v1033_v61 = vpop.f32.mrf.mxu1  ;;  %v1020_v0 = vadd.f32 %v1019_v8, %v1006_v62 }
 0x103   :  { %v1034_v6 = vadd.f32 %v1033_v61, %v1020_v0 }
 0x108   :  { %v1047_v2 = vpop.f32.mrf.mxu2  ;;  %v1021_v5 = vpop.f32.mrf.mxu0 }
 0x109   :  { %v1061_v4 = vpop.f32.mrf.mxu3  ;;  %v1022_v7 = vadd.f32 %v1021_v5, %v1008_v3  ;;  %v1048_v9 = vadd.f32 %v1047_v2, %v1034_v6  ;;  %v1035_v11 = vpop.f32.mrf.mxu1 }
 0x10b   :  { %v1036_v12 = vadd.f32 %v1035_v11, %v1022_v7  ;;  %v1062_v14 = vadd.f32 %v1061_v4, %v1048_v9 }
 0x10d   :  { %v1067_v19 = vmax.f32 %v1062_v14, 0.0 }
 0x110   :  { %v1049_v13 = vpop.f32.mrf.mxu2 }
 0x111   :  { %v1050_v15 = vadd.f32 %v1049_v13, %v1036_v12  ;;  %v1063_v16 = vpop.f32.mrf.mxu3 }
 0x113   :  { %v1064_v18 = vadd.f32 %v1063_v16, %v1050_v15 }
 0x115   :  { %v1069_v20 = vmax.f32 %v1064_v18, 0.0 }
 0x117   :  { %v1071_v21 = vpack.c.bf16 %v1069_v20, %v1067_v19 }
 0x119   :  { %1292 = vmatmul.bf16.vlgmr.msra.gmra.mxu1 %v1071_v21  ;;  %1320 = vmatmul.bf16.vlgmr.msra.gmra.mxu3 %v1071_v21 }
 0x156   :  { %v1279_v23 = vpop.f32.mrf.mxu0 }
 0x157   :  { %v1280_v25 = vadd.f32 %v1279_v23, %v1106_v24 }
 0x15c   :  { %v1307_v26 = vpop.f32.mrf.mxu2 }
 0x15d   :  { %v1308_v32 = vadd.f32 %v1307_v26, %v1107_v28 }
 0x15e   :  { %v1281_v31 = vpop.f32.mrf.mxu0 }
 0x15f   :  { %v1282_v34 = vadd.f32 %v1281_v31, %v1106_v24 }
 0x164   :  { %v1309_v1 = vpop.f32.mrf.mxu2 }
 0x165   :  { %v1310_v41 = vadd.f32 %v1309_v1, %v1107_v28 }
 0x196   :  { %v1293_v27 = vpop.f32.mrf.mxu1 }
 0x197   :  { %v1294_v29 = vadd.f32 %v1293_v27, %v1280_v25 }
 0x199   :  { %v1326_v30 = vmax.f32 %v1294_v29, 0.0 }
 0x19b   :  { %1330 = vst [vmem:[%s3275_s5] sm:$0xff] %v1326_v30 }
 0x19c   :  { %v1321_v33 = vpop.f32.mrf.mxu3 }
 0x19d   :  { %v1322_v35 = vadd.f32 %v1321_v33, %v1308_v32 }
 0x19e   :  { %v1295_v36 = vpop.f32.mrf.mxu1 }
 0x19f   :  { %v1327_v37 = vmax.f32 %v1322_v35, 0.0  ;;  %v1296_v38 = vadd.f32 %v1295_v36, %v1282_v34 }
 0x1a1   :  { %1331 = vst [vmem:[%s3275_s5 + $0x8] sm:$0xff] %v1327_v37  ;;  %v1328_v40 = vmax.f32 %v1296_v38, 0.0 }
 0x1a3   :  { %1332 = vst [vmem:[%s3275_s5 + $0x10] sm:$0xff] %v1328_v40 }
 0x1a4   :  { %v1323_v42 = vpop.f32.mrf.mxu3 }
 0x1a5   :  { %v1324_v45 = vadd.f32 %v1323_v42, %v1310_v41 }
 0x1a7   :  { %v1329_v46 = vmax.f32 %v1324_v45, 0.0 }
 0x1a9   :  { %1333 = vst [vmem:[%s3275_s5 + $0x18] sm:$0xff] %v1329_v46 }

</bundles_post_ra>
